<compile_context>
chip_gen: v5e
topology: v5e:2x2
jax: 0.10.0
libtpu: 0.0.40
codegen_flags: <defaults>
</compile_context>

<pallas_src>
import functools

import jax
import jax.numpy as jnp
from jax.experimental import pallas as pl
from jax.experimental.pallas import tpu as pltpu


_TS_SUB = 64  # in-kernel compute chunk (rows); keeps live vregs well under 64


def _round_up(x: int, m: int) -> int:
    return (x + m - 1) // m * m


def _greedy_argmax_kernel(em_ref, idx_ref):
    """Row-wise argmax over the label (lane) axis of a (TS, L) tile.

    Time sits on sublanes, labels on lanes (L <= 128 for CTC char vocabs).
    First-occurrence tie-break matches torch.argmax.  NaN inputs are undefined
    behavior here (torch.argmax would return the NaN position); CTC emissions
    are logits / log-probs and contain no NaN, so the scrub is omitted.
    """
    TS, L = em_ref.shape
    chunk = TS if TS <= _TS_SUB else _TS_SUB  # TS % _TS_SUB == 0 when TS > _TS_SUB
    n_sub = TS // chunk

    @pl.loop(0, n_sub)
    def _(c):
        r0 = pl.multiple_of(c * chunk, chunk)
        # f32 compare path: a no-op for f32 inputs; keeps bf16 inputs correct
        # on v5e (no bf16 VPU).  The VPU/XLU work hides under the HBM DMA.
        x = em_ref[pl.ds(r0, chunk), :].astype(jnp.float32)
        lane_iota = jax.lax.broadcasted_iota(jnp.int32, (chunk, L), 1)
        m = jnp.max(x, axis=-1, keepdims=True)              # XLU lane reduce
        cand = jnp.where(x == m, lane_iota, jnp.int32(L))   # VPU select
        idx_ref[pl.ds(r0, chunk), :] = jnp.min(cand, axis=-1, keepdims=True)


def _choose_time_tile(S: int, L: int, itemsize: int):
    """Pick (time_tile, grid_len) for an (S, L) emission."""
    if S <= 8:
        return S, 1  # single tiny tile; block dims equal the full array dims
    # Per-buffer VMEM footprint, counting the 128-lane padding Mosaic applies
    # to the minor dim.  ~8 MiB total double-buffered stays well inside v5e's
    # 16 MiB scoped-VMEM default (v6e/v7x defaults are 32 MiB).
    in_row = _round_up(L, 128) * itemsize
    out_row = 128 * 4                       # (ts, 1) int32 block, lane-padded
    ts_max = max(_TS_SUB, (8 * 1024 * 1024) // (2 * (in_row + out_row)))
    ts_max = ts_max // _TS_SUB * _TS_SUB
    nt = max(-(-S // ts_max), 2)            # >=2 grid steps: v7x has 2 TensorCores
    nt = _round_up(nt, 2)                   # even tile count for the 2-TC split
    ts = -(-S // nt)                        # balanced tiles: never pad ~a whole tile
    ts = _round_up(ts, _TS_SUB) if ts > _TS_SUB else _round_up(ts, 8)
    return ts, -(-S // ts)


@jax.jit
def greedy_argmax(emission: jax.Array) -> jax.Array:
    """emission: (num_seq, num_label) f32/bf16 -> (num_seq,) int32 best labels."""
    S, L = emission.shape
    ts, grid = _choose_time_tile(S, L, jnp.dtype(emission.dtype).itemsize)
    out = pl.pallas_call(
        _greedy_argmax_kernel,
        out_shape=jax.ShapeDtypeStruct((S, 1), jnp.int32),
        grid=(grid,),
        in_specs=[pl.BlockSpec((ts, L), lambda i: (i, 0))],
        out_specs=pl.BlockSpec((ts, 1), lambda i: (i, 0)),
        compiler_params=pltpu.CompilerParams(
            dimension_semantics=("parallel",)),
    )(emission)
    return out[:, 0]


@functools.partial(jax.jit, static_argnames=("blank",))
def _greedy_decode_device(emission: jax.Array, blank: int):
    """Argmax + unique_consecutive/blank collapse + compaction, all on device."""
    idx = greedy_argmax(emission)
    S = idx.shape[0]
    prev = jnp.concatenate([jnp.full((1,), -1, idx.dtype), idx[:-1]])
    keep = (idx != prev) & (idx != blank)
    pos = jnp.cumsum(keep.astype(jnp.int32)) - 1
    n_kept = jnp.sum(keep).astype(jnp.int32)
    scatter_idx = jnp.where(keep, pos, S)          # S = out-of-range -> dropped
    compact = jnp.zeros((S,), jnp.int32).at[scatter_idx].set(idx, mode="drop")
    return compact, n_kept


class GreedyCTCDecoder:
    """JAX/Pallas port of the PyTorch GreedyCTCDecoder."""

    def __init__(self, tgt_dict, blank=0):
        self.labels = self.create_labels(tgt_dict)
        self.blank = blank

    @staticmethod
    def create_labels(tgt_dict):
        labels = [0] * len(tgt_dict)
        for key, value in tgt_dict.items():
            labels[value] = key
        return labels

    def forward(self, emission: jax.Array):
        # Hot path (argmax + collapse + compaction) runs on device in one jit.
        compact, n_kept = _greedy_decode_device(jnp.asarray(emission), self.blank)
        compact, n_kept = jax.device_get((compact, n_kept))
        # TODO(synk): string join has no array equivalent; it stays on host,
        # but only over the n_kept surviving symbols.
        joined = "".join(self.labels[int(i)] for i in compact[: int(n_kept)])
        return joined.replace("|", " ").strip().split()

    __call__ = forward


def _host_reference_transcript(idx_list, labels, blank):
    uniq = []
    for i in idx_list:
        if not uniq or uniq[-1] != i:
            uniq.append(i)
    uniq = [i for i in uniq if i != blank]
    joined = "".join(labels[i] for i in uniq)
    return joined.replace("|", " ").strip().split()


if __name__ == "__main__":
    # Deterministic synthetic setup (small shapes implied by the module).
    num_seq, num_label = 16, 32
    chars = ["-", "|"] + list("abcdefghijklmnopqrstuvwxyz") + ["'", ".", ",", "?"]
    assert len(chars) == num_label
    tgt_dict = {c: i for i, c in enumerate(chars)}

    key = jax.random.PRNGKey(0)
    emission = jax.random.normal(key, (num_seq, num_label), dtype=jnp.float32)

    decoder = GreedyCTCDecoder(tgt_dict, blank=0)

    # 1) Kernel vs pure-JAX reference argmax on the small example (grid=2 path).
    kernel_idx = greedy_argmax(emission)
    jax.block_until_ready(kernel_idx)
    ref_idx = jnp.argmax(emission, axis=-1).astype(jnp.int32)
    assert bool(jnp.all(kernel_idx == ref_idx)), "Pallas argmax mismatch (small)"

    # 2) Multi-tile grid + ragged last block + non-multiple-of-128 label dim.
    em_big = jax.random.normal(jax.random.PRNGKey(0), (2500, 29), dtype=jnp.float32)
    big_idx = greedy_argmax(em_big)
    jax.block_until_ready(big_idx)
    ref_big = jnp.argmax(em_big, axis=-1).astype(jnp.int32)
    assert bool(jnp.all(big_idx == ref_big)), "Pallas argmax mismatch (tiled)"

    # 3) Tiny-S path (block dims equal the full array dims).
    em_tiny = jax.random.normal(jax.random.PRNGKey(0), (5, 29), dtype=jnp.float32)
    tiny_idx = greedy_argmax(em_tiny)
    jax.block_until_ready(tiny_idx)
    ref_tiny = jnp.argmax(em_tiny, axis=-1).astype(jnp.int32)
    assert bool(jnp.all(tiny_idx == ref_tiny)), "Pallas argmax mismatch (tiny)"

    # 4) End-to-end transcript vs pure host reference.
    transcript = decoder(emission)
    assert isinstance(transcript, list)
    ref_transcript = _host_reference_transcript(
        [int(i) for i in jax.device_get(ref_idx)], chars, blank=0)
    assert transcript == ref_transcript, "transcript mismatch"

    print("KERNEL_OK")
</pallas_src>

<mosaic_0001>
module attributes {stable_mosaic.version = 11 : i64} {
  func.func @_greedy_argmax_kernel(%arg0: i32, %arg1: memref<8x32xf32, #tpu.memory_space<vmem>>, %arg2: memref<8x1xi32, #tpu.memory_space<vmem>>) attributes {dimension_semantics = [#tpu.dimension_semantics<parallel>], iteration_bounds = array<i64: 2>, scalar_prefetch = 0 : i64, scratch_operands = 0 : i64, tpu.core_type = #tpu.core_type<tc>, window_params = [{transform_indices = @transform_0, window_bounds = array<i64: 8, 32>}, {transform_indices = @transform_1, window_bounds = array<i64: 8, 1>}]} {
    %c0_i32 = arith.constant 0 : i32
    %c1_i32 = arith.constant 1 : i32
    %0 = arith.muli %c0_i32, %c1_i32 : i32
    %c0_i32_0 = arith.constant 0 : i32
    %1 = arith.addi %c0_i32_0, %0 : i32
    %c8_i32 = arith.constant 8 : i32
    %2 = arith.muli %1, %c8_i32 : i32
    %3 = tpu.assume_multiple %2, 8 : i32
    %4 = arith.index_cast %3 : i32 to index
    %c0 = arith.constant 0 : index
    %5 = vector.load %arg1[%4, %c0] : memref<8x32xf32, #tpu.memory_space<vmem>>, vector<8x32xf32>
    %6 = tpu.iota {dimensions = array<i32: 1>} : vector<8x32xi32>
    %cst = arith.constant dense<0xFF800000> : vector<8xf32>
    %7 = vector.multi_reduction <maximumf>, %5, %cst [1] : vector<8x32xf32> to vector<8xf32>
    %8 = vector.shape_cast %7 : vector<8xf32> to vector<8x1xf32>
    %9 = vector.broadcast %8 : vector<8x1xf32> to vector<8x32xf32>
    %10 = arith.cmpf oeq, %5, %9 : vector<8x32xf32>
    %c32_i32 = arith.constant 32 : i32
    %11 = vector.broadcast %c32_i32 : i32 to vector<8x32xi32>
    %12 = arith.select %10, %6, %11 : vector<8x32xi1>, vector<8x32xi32>
    %cst_1 = arith.constant dense<2147483647> : vector<8xi32>
    %13 = vector.multi_reduction <minsi>, %12, %cst_1 [1] : vector<8x32xi32> to vector<8xi32>
    %14 = vector.shape_cast %13 : vector<8xi32> to vector<8x1xi32>
    %15 = arith.index_cast %3 : i32 to index
    %c0_2 = arith.constant 0 : index
    %16 = vector.load %arg2[%15, %c0_2] : memref<8x1xi32, #tpu.memory_space<vmem>>, vector<8x1xi32>
    tpu.vector_store %arg2[%15, %c0_2], %14 {strides = array<i32>} : memref<8x1xi32, #tpu.memory_space<vmem>>, vector<8x1xi32>,
    %c1_i32_3 = arith.constant 1 : i32
    return
  }
  func.func @transform_0(%arg0: i32) -> (i32, i32) {
    %c0_i32 = arith.constant 0 : i32
    %c0_i32_0 = arith.constant 0 : i32
    return %arg0, %c0_i32 : i32, i32
  }
  func.func @transform_1(%arg0: i32) -> (i32, i32) {
    %c0_i32 = arith.constant 0 : i32
    %c0_i32_0 = arith.constant 0 : i32
    return %arg0, %c0_i32 : i32, i32
  }
}

</mosaic_0001>

<bundles_post_ra>
// kernel: greedy_argmax.1
= control target key start
LH: loop header
LB: loop body
LE: loop exit
PB: predicated region body
PF: predicated region fallthrough
CT: control target
= control target key end

     0   :  { %6 = vsyncpa [#allocation3], 0  ;;  %s444_s0 = inlined_call_operand.hbm [shape: f32[16,32], index: 0, kind: input, shape index: {}]   ;;  %s445_s1 = inlined_call_operand.vmem [shape: s32[16,1], index: 1, kind: output, shape index: {}]  }
   0x1   :  { %8 = vsyncpa [#allocation3 + $0x1], 0  ;;  %s350_s6 = smov 0   ;;  %s352_s7 = smov 0  }
   0x2   :  { %s354_s8 = smov 0   ;;  %s356_s9 = smov 0  }
   0x3 LB: > { %s369_s10 = sadd.s32 4294967295, %s338_s9   ;;  %s372_s11 = sadd.s32 1, %s338_s9   ;;  %s338_s9 = sphi %s356_s9, %s452_s9   ;;  %s334_s8 = sphi %s354_s8, %s451_s8   ;;  %s330_s7 = sphi %s352_s7, %s450_s7   ;;  %s326_s6 = sphi %s350_s6, %s449_s6  }
   0x4   : > { %s18_s12 = ssub.s32 %s338_s9, %s372_s11  ;;  %s21_s13 = sadd.s32 1, %s334_s8 }
   0x5   : > { %p19_p0 = scmp.eq.s32.totalorder %s18_s12, 0  ;;  %p28_p1 = scmp.ne.s32.totalorder %s334_s8, %s330_s7 }
   0x6   : > { %p29_p2 = scmp.eq.s32.totalorder %s338_s9, 0  ;;  %p34_p3 = scmp.ne.s32.totalorder %s330_s7, %s326_s6 }
   0x7   : > { %s382_s14 = scalar_select %p19_p0, %s334_s8, %s21_s13  }
   0x8   : > { %p384_p4 = por %p29_p2, %p28_p1  ;;  %p35_p5 = scmp.eq.s32.totalorder %s369_s10, 0 }
   0x9   : > { %p241_p6 = scmp.lt.s32.totalorder %s338_s9, 2  ;;  %s84_s17 = sand.u32 1, %s334_s8  }
   0xa   : > { %p390_p7 = por %p35_p5, %p34_p3  ;;  %s228_s18 = sshll.u32 %s84_s17, 3 }
   0xb   : > { %s229_s19 = sshll.u32 %s338_s9, 3  ;;  %s88_s23 = scalar_lea.vmem [#allocation2], %s228_s18 }
   0xc   : > { %s92_s22 = scalar_lea.hbm %s444_s0, %s229_s19  ;;  %s96_s24 = sshll.u32 %s88_s23, 4  ;;  %s97_s24 = int_to_ptr.vmem [resolvable:$true] %s96_s24 }
   0xd   : > { %s94_s25 = sshll.u32 %s92_s22, 4  ;;  %p401_p8 = pnand %p241_p6, %p384_p4  ;;  %s95_s25 = int_to_ptr.hbm [resolvable:$true] %s94_s25 }
   0xe   : > { %p230_p9 = scmp.ge.s32.totalorder %s338_s9, 1  ;;  %p101_p10 = scmp.lt.s32.totalorder %s338_s9, 3 }
   0xf   : > { %s85_s27 = scalar_lea.sflag [#allocation3], %s84_s17  ;;  %s274_s28 = sshra.s32 %s95_s25, 4  ;;  %s275_s28 = int_to_ptr.hbm [resolvable:$true] %s274_s28 }
  0x10   : > { %s276_s29 = scalar_lea.hbm %s275_s28, 8  ;;  %p278_p12 = pneg %p401_p8 }
  0x11   : > { %p277_p11 = scmp.ne.s32.totalorder %s275_s28, %s276_s29  ;;  %s281_s3 = scalar_lea.hbm %s444_s0, 16 }
  0x12   : > { %p282_p1 = scmp.lt.s32.totalorder %s275_s28, %s444_s0  ;;  %p283_p2 = scmp.lt.s32.totalorder %s281_s3, %s276_s29 }
  0x13   : > { %p279_p13 = pnand %p278_p12, %p277_p11 }
  0x14   : > { %p284_p3 = por %p283_p2, %p282_p1 }
  0x15   : > { %p280_p0 = pneg %p279_p13 }
  0x17   : > { %p285_p4 = pnand %p284_p3, %p280_p0 }
  0x19   : > { %288 = shalt.err (!%p285_p4)
}
  0x1a   : > { %240 = dma.hbm_to_vmem [thread:$0]  (!%p401_p8), %s95_s25, 128, %s97_s24, %s85_s27  }
  0x1b   : > { %p102_p5 = pnand %p230_p9, %p101_p10 }
  0x1c   : > { %s107_s6 = sand.u32 (!%p102_p5), 1, %s330_s7  }
  0x1d   : > { %105 = sbr.rel (%p102_p5) target bundleno = 399 (0x18f), region = 24  ;;  %s231_s12 = sshll.u32 (!%p102_p5), %s107_s6, 3 }
  0x1e   : > { %s108_s13 = scalar_lea.sflag (!%p102_p5), [#allocation3], %s107_s6  ;;  %s111_s15 = scalar_lea.vmem (!%p102_p5), [#allocation2], %s231_s12 }
  0x22   : > { %321 = dma.done.wait (%p390_p7), %s108_s13, 128  }
  0x23   : > { %323 = vsyncadd (%p390_p7), %s108_s13, 4294967168  ;;  %vm137_vm0 = vcmask 261120   ;;  %v134_v0 = vld [vmem:[%s111_s15] sm:$0xff]  ;;  %v135_v2 = vlaneseq  ;;  %p130_p6 = scmp.lt.s32.totalorder %s369_s10, 1  ;;  %vm158_vm3 = vcmask 7168  }
  0x24   : > { %v138_v1 = vsel %vm137_vm0, %v134_v0, -inf }
  0x25   : > { %139 = vmax.xlane.f32.xlu0 %v138_v1  ;;  %v136_v3 = vand.u32 127, %v135_v2  ;;  %s454_s10 = smov (!%p130_p6, %s369_s10), 1 }
  0x26   : > { %s232_s9 = sshll.u32 %s454_s10, 3 }
  0x27   : > { %s133_s18 = scalar_lea.vmem %s445_s1, %s232_s9 }
  0x98   : > { %v140_v4 = vpop.xlane.xlu0 %139 }
  0x99   : > { %vm141_vm1 = vcmp.eq.f32.partialorder %v134_v0, %v140_v4 }
  0x9a   : > { %v142_v5 = vsel %vm141_vm1, %v136_v3, 32 }
  0x9b   : > { %v143_v6 = vsel %vm137_vm0, %v142_v5, 2147483647 }
  0x9c   : > { %v145_v7 = vshra.s32 %v143_v6, 16  ;;  %v144_v9 = vand.u32 65535, %v143_v6 }
  0x9e   : > { %v147_v8 = vcvt.s32.f32 %v145_v7  ;;  %v146_v11 = vcvt.s32.f32 %v144_v9 }
  0xa0   : > { %148 = vmin.xlane.f32.xlu0 %v147_v8 }
 0x113   : > { %v149_v10 = vpop.xlane.xlu0 %148 }
 0x114   : > { %vm150_vm2 = vcmp.eq.f32.partialorder %v147_v8, %v149_v10  ;;  %v155_v13 = vcvt.f32.s32 %v149_v10 }
 0x115   : > { %v151_v12 = vsel %vm150_vm2, %v146_v11, inf }
 0x116   : > { %152 = vmin.xlane.f32.xlu1 %v151_v12  ;;  %v156_v15 = vshll.u32 %v155_v13, 16 }
 0x189   : > { %v153_v14 = vpop.xlane.xlu1 %152 }
 0x18a   : > { %v154_v16 = vcvt.f32.s32 %v153_v14 }
 0x18c   : > { %v157_v17 = vadd.s32 %v156_v15, %v154_v16 }
 0x18e   : > { %159 = vst.msk [vmem:[%s133_s18] sm:$0xff] %vm158_vm3, %v157_v17 }
 0x18f PF: > { %p11_p7 = scmp.ge.s32.totalorder %s372_s11, 4   ;;  %s449_s6 = smov %s330_s7 }
 0x190   : > { %s450_s7 = smov %s334_s8  ;;  %s451_s8 = smov %s382_s14 }
 0x191   : > { %s452_s9 = smov %s372_s11  ;;  %13 = sbr.rel (!%p11_p7) target bundleno = 3 (0x3), region = 64 }
 0x196   :  { %179 = vsyncpa [#allocation3], 1 }
 0x197   :  { %181 = vsyncpa [#allocation3 + $0x1], 1 }

</bundles_post_ra>
